<compile_context>
chip_gen: v6e
topology: v6e:2x2x1
jax: 0.10.0
libtpu: 0.0.40
codegen_flags: <defaults>
</compile_context>

<pallas_src>
import math
import jax
import jax.numpy as jnp
from jax.experimental import pallas as pl
from jax.experimental.pallas import tpu as pltpu


def gcn_kernel(x_ref, w_ref, att_ref, b_ref, o_ref):
    # x_ref:   (N, B*F_in)        bf16  -- batch folded into lanes
    # w_ref:   (B*F_in, B*F_out)  bf16  -- block-diagonal weight
    # att_ref: (N, N)             bf16
    # b_ref:   (1, B*F_out)       f32   -- bias tiled per batch block
    # o_ref:   (N, B*F_out)       f32   -- lane-dense output slab
    support = jnp.dot(x_ref[...], w_ref[...],
                      preferred_element_type=jnp.float32)            # (N, B*F_out)
    out = jnp.dot(att_ref[...], support.astype(jnp.bfloat16),
                  preferred_element_type=jnp.float32)                # (N, B*F_out)
    o_ref[...] = (out + b_ref[...]).astype(o_ref.dtype)


def graph_convolution(x, weight, att, bias=None):
    """x: [B, N, F_in], weight: [F_in, F_out], att: [N, N], bias: [F_out] or None."""
    B, N, F_in = x.shape
    F_out = weight.shape[1]
    cdt = jnp.bfloat16

    # Fold batch into lanes: (B, N, F_in) -> (N, B*F_in).
    x_wide = jnp.transpose(x, (1, 0, 2)).reshape(N, B * F_in).astype(cdt)

    # Block-diagonal weight so one matmul applies W independently per batch block.
    w_blk = jnp.kron(jnp.eye(B, dtype=cdt), weight.astype(cdt))      # (B*F_in, B*F_out)

    att_c = att.astype(cdt)

    if bias is None:
        bias_wide = jnp.zeros((1, B * F_out), dtype=jnp.float32)
    else:
        bias_wide = jnp.tile(bias.astype(jnp.float32).reshape(1, F_out), (1, B))

    # TODO(synk): for large node_n / batch, switch to a row-tiled grid over att with a
    # reduction axis + VMEM accumulator (and split batch over the 2 TCs on v7x);
    # at N=48, B=2 everything fits in a single VMEM tile, so grid=() is optimal.
    out_wide = pl.pallas_call(
        gcn_kernel,
        out_shape=jax.ShapeDtypeStruct((N, B * F_out), jnp.float32),
        in_specs=[
            pl.BlockSpec(memory_space=pltpu.MemorySpace.VMEM),
            pl.BlockSpec(memory_space=pltpu.MemorySpace.VMEM),
            pl.BlockSpec(memory_space=pltpu.MemorySpace.VMEM),
            pl.BlockSpec(memory_space=pltpu.MemorySpace.VMEM),
        ],
        out_specs=pl.BlockSpec(memory_space=pltpu.MemorySpace.VMEM),
    )(x_wide, w_blk, att_c, bias_wide)

    # Unfold lanes back to (B, N, F_out).
    out = out_wide.reshape(N, B, F_out).transpose(1, 0, 2)
    return out.astype(x.dtype)


if __name__ == "__main__":
    # Shapes consistent with the module: node_n=48, in_features=32, out_features=64
    B, node_n, in_features, out_features = 2, 48, 32, 64

    key = jax.random.PRNGKey(0)
    k_x, k_w, k_att, k_b = jax.random.split(key, 4)

    # Deterministic init mirroring reset_parameters(): U(-stdv, stdv), stdv=1/sqrt(out_features)
    stdv = 1.0 / math.sqrt(out_features)
    weight = jax.random.uniform(k_w, (in_features, out_features),
                                minval=-stdv, maxval=stdv, dtype=jnp.float32)
    att = jax.random.uniform(k_att, (node_n, node_n),
                             minval=-stdv, maxval=stdv, dtype=jnp.float32)
    bias = jax.random.uniform(k_b, (out_features,),
                              minval=-stdv, maxval=stdv, dtype=jnp.float32)

    x = jax.random.normal(k_x, (B, node_n, in_features), dtype=jnp.float32)

    out = graph_convolution(x, weight, att, bias)
    out = jax.block_until_ready(out)

    # Pure-f32 reference; kernel uses bf16 matmul inputs with f32 accumulation,
    # so allow bf16-level tolerance (observed error ~1e-3 at these magnitudes).
    ref = jnp.matmul(att, jnp.matmul(x, weight)) + bias
    assert out.shape == (B, node_n, out_features)
    assert jnp.allclose(out, ref, atol=2e-2, rtol=2e-2), "mismatch vs reference"

    print("KERNEL_OK")
</pallas_src>

<mosaic_0001>
module attributes {stable_mosaic.version = 11 : i64} {
  func.func @gcn_kernel(%arg0: memref<48x64xbf16, #tpu.memory_space<vmem>>, %arg1: memref<64x128xbf16, #tpu.memory_space<vmem>>, %arg2: memref<48x48xbf16, #tpu.memory_space<vmem>>, %arg3: memref<1x128xf32, #tpu.memory_space<vmem>>, %arg4: memref<48x128xf32, #tpu.memory_space<vmem>>) attributes {dimension_semantics = [], scalar_prefetch = 0 : i64, scratch_operands = 0 : i64, tpu.core_type = #tpu.core_type<tc>} {
    %c0 = arith.constant 0 : index
    %c0_0 = arith.constant 0 : index
    %0 = vector.load %arg0[%c0, %c0_0] : memref<48x64xbf16, #tpu.memory_space<vmem>>, vector<48x64xbf16>
    %c0_1 = arith.constant 0 : index
    %c0_2 = arith.constant 0 : index
    %1 = vector.load %arg1[%c0_1, %c0_2] : memref<64x128xbf16, #tpu.memory_space<vmem>>, vector<64x128xbf16>
    %cst = arith.constant dense<0.000000e+00> : vector<48x128xf32>
    %2 = tpu.matmul %0, %1, %cst {dimension_numbers = #tpu.dot_dimension_numbers<[1], [0], [0], [1], [0, 0, 1, 1], [], []>} : vector<48x64xbf16>, vector<64x128xbf16>, vector<48x128xf32> -> vector<48x128xf32>
    %c0_3 = arith.constant 0 : index
    %c0_4 = arith.constant 0 : index
    %3 = vector.load %arg2[%c0_3, %c0_4] : memref<48x48xbf16, #tpu.memory_space<vmem>>, vector<48x48xbf16>
    %4 = arith.truncf %2 : vector<48x128xf32> to vector<48x128xbf16>
    %cst_5 = arith.constant dense<0.000000e+00> : vector<48x128xf32>
    %5 = tpu.matmul %3, %4, %cst_5 {dimension_numbers = #tpu.dot_dimension_numbers<[1], [0], [0], [1], [0, 0, 1, 1], [], []>} : vector<48x48xbf16>, vector<48x128xbf16>, vector<48x128xf32> -> vector<48x128xf32>
    %c0_6 = arith.constant 0 : index
    %c0_7 = arith.constant 0 : index
    %6 = vector.load %arg3[%c0_6, %c0_7] : memref<1x128xf32, #tpu.memory_space<vmem>>, vector<1x128xf32>
    %7 = vector.broadcast %6 : vector<1x128xf32> to vector<48x128xf32>
    %8 = arith.addf %5, %7 : vector<48x128xf32>
    %c0_8 = arith.constant 0 : index
    %c0_9 = arith.constant 0 : index
    %9 = vector.load %arg4[%c0_8, %c0_9] : memref<48x128xf32, #tpu.memory_space<vmem>>, vector<48x128xf32>
    tpu.vector_store %arg4[%c0_8, %c0_9], %8 {strides = array<i32>} : memref<48x128xf32, #tpu.memory_space<vmem>>, vector<48x128xf32>,
    return
  }
}

</mosaic_0001>

<bundles_post_ra>
// kernel: tpu_custom_call.1
= control target key start
LH: loop header
LB: loop body
LE: loop exit
PB: predicated region body
PF: predicated region fallthrough
CT: control target
= control target key end

     0   :  { %9 = vsyncpa [#allocation3], 0  ;;  %s532_s0 = inlined_call_operand.hbm [shape: bf16[48,64], index: 0, kind: input, shape index: {}]   ;;  %s533_s1 = inlined_call_operand.hbm [shape: bf16[64,128], index: 1, kind: input, shape index: {}]   ;;  %s534_s2 = inlined_call_operand.hbm [shape: bf16[48,48], index: 2, kind: input, shape index: {}]   ;;  %s535_s3 = inlined_call_operand.vmem [shape: f32[1,128], index: 3, kind: input, shape index: {}]   ;;  %s536_s4 = inlined_call_operand.hbm [shape: f32[48,128], index: 4, kind: output, shape index: {}]  }
   0x1   :  { %10 = vsyncpa [#allocation6], 0 }
   0x2   :  { %11 = vsyncpa [#allocation4], 0  ;;  %s476_s15 = smov [#allocation5]   ;;  %s477_s17 = smov [#allocation2]  }
   0x3   :  { %s29_s16 = sshll.u32 %s476_s15, 4  ;;  %s17_s18 = sshll.u32 %s477_s17, 4  ;;  %s30_s16 = int_to_ptr.vmem [resolvable:$true] %s29_s16  ;;  %s18_s18 = int_to_ptr.vmem [resolvable:$true] %s17_s18 }
   0x4   :  { %s398_s19 = scalar_lea.vmem %s30_s16, 512  ;;  %p403_p1 = scmp.lt.s32.totalorder %s30_s16, %s30_s16 }
   0x5   :  { %p399_p0 = scmp.ne.s32.totalorder %s30_s16, %s398_s19  ;;  %p404_p2 = scmp.lt.s32.totalorder %s398_s19, %s398_s19 }
   0x7   :  { %p405_p3 = por %p404_p2, %p403_p1 }
   0x9   :  { %p406_p4 = pnand %p405_p3, %p399_p0 }
   0xb   :  { %409 = shalt.err (!%p406_p4)
}
   0xc   :  { %s478_s20 = smov 64   ;;  %s479_s21 = smov 4  }
   0xd   :  { %35 = dma.hbm_to_vmem [thread:$0]  %s533_s1, 512, %s30_s16, [#allocation6], %s478_s20, %s478_s20, %s479_s21  }
   0xe   :  { %s418_s24 = scalar_lea.vmem %s18_s18, 384  ;;  %p423_p6 = scmp.lt.s32.totalorder %s18_s18, %s18_s18 }
   0xf   :  { %p419_p5 = scmp.ne.s32.totalorder %s18_s18, %s418_s24  ;;  %p424_p7 = scmp.lt.s32.totalorder %s418_s24, %s418_s24 }
  0x11   :  { %p425_p8 = por %p424_p7, %p423_p6 }
  0x13   :  { %p426_p9 = pnand %p425_p8, %p419_p5 }
  0x15   :  { %429 = shalt.err (!%p426_p9)
}
  0x16   :  { %23 = dma.hbm_to_vmem [thread:$0]  %s532_s0, 384, %s18_s18, [#allocation3], %s478_s20, %s478_s20, %s479_s21  }
  0x17   :  { %s480_s27 = smov [#allocation7]  }
  0x18   :  { %s41_s28 = sshll.u32 %s480_s27, 4  ;;  %s42_s28 = int_to_ptr.vmem [resolvable:$true] %s41_s28 }
  0x19   :  { %s438_s29 = scalar_lea.vmem %s42_s28, 384  ;;  %p443_p11 = scmp.lt.s32.totalorder %s42_s28, %s42_s28 }
  0x1a   :  { %p439_p10 = scmp.ne.s32.totalorder %s42_s28, %s438_s29  ;;  %p444_p12 = scmp.lt.s32.totalorder %s438_s29, %s438_s29 }
  0x1c   :  { %p445_p13 = por %p444_p12, %p443_p11 }
  0x1e   :  { %p446_p0 = pnand %p445_p13, %p439_p10 }
  0x20   :  { %449 = shalt.err (!%p446_p0)
}
  0x21   :  { %47 = dma.hbm_to_vmem [thread:$0]  %s534_s2, 384, %s42_s28, [#allocation6], %s478_s20, %s478_s20, %s479_s21  }
  0x22   :  { %470 = dma.done.wait [#allocation3], 384  }
  0x23   :  { %471 = vsyncadd [#allocation3], 4294966912 }
  0x24   :  { %472 = dma.done.wait [#allocation6], 896  }
  0x25   :  { %473 = vsyncadd [#allocation6], 4294966400  ;;  %v481_v0 = vmov 0.0   ;;  %vm482_vm0 = vmmov 0   ;;  %v380_v1 = vld [vmem:[#allocation5 + $0x18] sm:$0xff]   ;;  %v381_v2 = vld [vmem:[#allocation5 + $0x10] sm:$0xff]  }
  0x26   :  { %332 = vmatprep.subr.bf16.mxu0 %v481_v0  ;;  %340 = vmatprep.mubr.msk.bf16.mxu0 %vm482_vm0, %v481_v0  ;;  %v382_v3 = vld [vmem:[#allocation5 + $0x8] sm:$0xff]   ;;  %v383_v4 = vld [vmem:[#allocation5] sm:$0xff]   ;;  %vm113_vm1 = vcmask 523264   ;;  %v385_v6 = vld [vmem:[#allocation2 + $0x8] sm:$0xff]   ;;  %vm211_vm2 = vcmask 392192   ;;  %s483_s5 = smov [#allocation8]  }
  0x27   :  { %352 = vmatprep.subr.bf16.mxu1 %v481_v0  ;;  %358 = vmatprep.mubr.msk.bf16.mxu1 %vm482_vm0, %v481_v0  ;;  %v384_v5 = vld [vmem:[#allocation2] sm:$0xff]   ;;  %v386_v7 = vld [vmem:[#allocation2 + $0x10] sm:$0xff]   ;;  %v387_v23 = vld [vmem:[#allocation7] sm:$0xff]  }
  0x28   :  { %333 = vmatpush3.bf16.msra.mxu0 %v380_v1  ;;  %v388_v24 = vld [vmem:[#allocation7 + $0x8] sm:$0xff]   ;;  %v389_v25 = vld [vmem:[#allocation7 + $0x10] sm:$0xff]  }
  0x29   :  { %334 = vmatprep.subr.bf16.mxu0 %v481_v0  ;;  %v312_v26 = vld [vmem:[%s535_s3] ss:$0 sm:$0xff]  ;;  %s289_s3 = sshll.u32 %s483_s5, 4  ;;  %s290_s3 = int_to_ptr.vmem [resolvable:$true] %s289_s3 }
  0x2a   :  { %s450_s6 = scalar_lea.vmem %s290_s3, 768  ;;  %p455_p2 = scmp.lt.s32.totalorder %s290_s3, %s290_s3 }
  0x2b   :  { %p451_p1 = scmp.ne.s32.totalorder %s290_s3, %s450_s6  ;;  %p456_p3 = scmp.lt.s32.totalorder %s450_s6, %s450_s6 }
  0x2c   :  { %335 = vmatpush3.bf16.msra.mxu0 %v381_v2 }
  0x2d   :  { %336 = vmatprep.subr.bf16.mxu0 %v481_v0  ;;  %p457_p4 = por %p456_p3, %p455_p2 }
  0x2f   :  { %p458_p5 = pnand %p457_p4, %p451_p1 }
  0x30   :  { %337 = vmatpush3.bf16.msra.mxu0 %v382_v3 }
  0x31   :  { %338 = vmatprep.subr.bf16.mxu0 %v481_v0 }
  0x34   :  { %339 = vmatpush3.bf16.msra.mxu0 %v383_v4 }
  0x37   :  { %341 = vmatmul.mubr.msk.bf16.vlgmr.msra.gmra.mxu0 %vm113_vm1, %v384_v5 }
  0x38   :  { %344 = vmatprep.mubr.msk.bf16.mxu0 %vm482_vm0, %v481_v0 }
  0x3f   :  { %345 = vmatmul.mubr.msk.bf16.gmra.mxu0 %vm113_vm1, %v385_v6 }
  0x40   :  { %348 = vmatprep.mubr.msk.bf16.mxu0 %vm482_vm0, %v481_v0 }
  0x47   :  { %349 = vmatmul.mubr.msk.bf16.gmra.mxu0 %vm113_vm1, %v386_v7 }
  0xf7   :  { %v157_v8 = vpop.f32.mrf.mxu0 }
  0xf9   :  { %v342_v9 = vpop.f32.mrf.mxu0 }
  0xfb   :  { %v160_v10 = vpop.f32.mrf.mxu0 }
  0xfc   :  { %v186_v22 = vpack.c.bf16 %v160_v10, %v157_v8 }
  0xfd   :  { %v343_v11 = vpop.f32.mrf.mxu0 }
  0xff   :  { %v165_v12 = vpop.f32.mrf.mxu0 }
 0x101   :  { %v346_v13 = vpop.f32.mrf.mxu0 }
 0x103   :  { %v168_v14 = vpop.f32.mrf.mxu0 }
 0x104   :  { %v187_v21 = vpack.c.bf16 %v168_v14, %v165_v12 }
 0x105   :  { %v347_v15 = vpop.f32.mrf.mxu0 }
 0x107   :  { %v173_v16 = vpop.f32.mrf.mxu0 }
 0x109   :  { %v350_v17 = vpop.f32.mrf.mxu0 }
 0x10b   :  { %v176_v18 = vpop.f32.mrf.mxu0 }
 0x10c   :  { %v188_v19 = vpack.c.bf16 %v176_v18, %v173_v16 }
 0x10d   :  { %v351_v20 = vpop.f32.mrf.mxu0 }
 0x10e   :  { %353 = vmatpush3.bf16.msra.mxu1 %v188_v19 }
 0x10f   :  { %354 = vmatprep.subr.bf16.mxu1 %v481_v0 }
 0x112   :  { %355 = vmatpush3.bf16.msra.mxu1 %v187_v21 }
 0x113   :  { %356 = vmatprep.subr.bf16.mxu1 %v481_v0 }
 0x116   :  { %357 = vmatpush3.bf16.msra.mxu1 %v186_v22 }
 0x119   :  { %359 = vmatmul.mubr.msk.bf16.vlgmr.msra.gmra.mxu1 %vm211_vm2, %v387_v23 }
 0x11a   :  { %362 = vmatprep.mubr.msk.bf16.mxu1 %vm482_vm0, %v481_v0 }
 0x121   :  { %363 = vmatmul.mubr.msk.bf16.gmra.mxu1 %vm211_vm2, %v388_v24 }
 0x122   :  { %366 = vmatprep.mubr.msk.bf16.mxu1 %vm482_vm0, %v481_v0 }
 0x129   :  { %367 = vmatmul.mubr.msk.bf16.gmra.mxu1 %vm211_vm2, %v389_v25 }
 0x1d9   :  { %v255_v27 = vpop.f32.mrf.mxu1 }
 0x1da   :  { %v256_v28 = vadd.f32 %v312_v26, %v255_v27 }
 0x1db   :  { %v360_v29 = vpop.f32.mrf.mxu1 }
 0x1dc   :  { %278 = vst [vmem:[#allocation8] sm:$0xff] %v256_v28 }
 0x1dd   :  { %v258_v30 = vpop.f32.mrf.mxu1 }
 0x1de   :  { %v259_v31 = vadd.f32 %v312_v26, %v258_v30 }
 0x1df   :  { %v361_v32 = vpop.f32.mrf.mxu1 }
 0x1e0   :  { %279 = vst [vmem:[#allocation8 + $0x8] sm:$0xff] %v259_v31 }
 0x1e1   :  { %v263_v33 = vpop.f32.mrf.mxu1 }
 0x1e2   :  { %v264_v34 = vadd.f32 %v312_v26, %v263_v33 }
 0x1e3   :  { %v364_v35 = vpop.f32.mrf.mxu1 }
 0x1e4   :  { %280 = vst [vmem:[#allocation8 + $0x10] sm:$0xff] %v264_v34 }
 0x1e5   :  { %v266_v36 = vpop.f32.mrf.mxu1 }
 0x1e6   :  { %v267_v37 = vadd.f32 %v312_v26, %v266_v36 }
 0x1e7   :  { %v365_v38 = vpop.f32.mrf.mxu1 }
 0x1e8   :  { %281 = vst [vmem:[#allocation8 + $0x18] sm:$0xff] %v267_v37 }
 0x1e9   :  { %v271_v39 = vpop.f32.mrf.mxu1 }
 0x1ea   :  { %v272_v40 = vadd.f32 %v312_v26, %v271_v39 }
 0x1eb   :  { %v368_v41 = vpop.f32.mrf.mxu1 }
 0x1ec   :  { %282 = vst [vmem:[#allocation8 + $0x20] sm:$0xff] %v272_v40 }
 0x1ed   :  { %v274_v42 = vpop.f32.mrf.mxu1 }
 0x1ee   :  { %v275_v43 = vadd.f32 %v312_v26, %v274_v42 }
 0x1ef   :  { %v369_v44 = vpop.f32.mrf.mxu1 }
 0x1f0   :  { %283 = vst [vmem:[#allocation8 + $0x28] sm:$0xff] %v275_v43 }
 0x1f1   :  { %461 = shalt.err (!%p458_p5)
}
 0x1f2   :  { %s484_s7 = smov 128   ;;  %s485_s8 = smov 8  }
 0x1f3   :  { %295 = dma.vmem_to_hbm [thread:$0]  %s290_s3, 768, %s536_s4, [#allocation4], %s484_s7, %s484_s7, %s485_s8  }
 0x1f4   :  { %474 = dma.done.wait [#allocation4], 768  }
 0x1f5   :  { %475 = vsyncadd [#allocation4], 4294966528 }
 0x1f6   :  { %299 = vsyncpa [#allocation3], 1 }
 0x1f7   :  { %300 = vsyncpa [#allocation6], 1 }
 0x1f8   :  { %301 = vsyncpa [#allocation4], 1 }

</bundles_post_ra>
